<compile_context>
chip_gen: v5e
topology: v5e:2x2
jax: 0.10.0
libtpu: 0.0.40
codegen_flags: <defaults>
</compile_context>

<pallas_src>
import jax
import jax.numpy as jnp
from jax.experimental import pallas as pl
from jax.experimental.pallas import tpu as pltpu


def _round_up(x, m):
    return ((x + m - 1) // m) * m


def _make_chair_kernel(agent_num, embed_size, compute_dtype):
    A, E = agent_num, embed_size

    def kernel(*refs):
        # refs: diff_0 .. diff_{A-1}, w1, b1, w2_pad, b2_pad, r, out
        diff_refs = refs[:A]
        w1_ref, b1_ref, w2_ref, b2_ref, r_ref, out_ref = refs[A:]

        # attn1: accumulate the per-agent row blocks of w1 on the MXU (f32 acc).
        h = jnp.dot(diff_refs[0][...], w1_ref[0:E, :],
                    preferred_element_type=jnp.float32)
        for a in range(1, A):
            h = h + jnp.dot(diff_refs[a][...], w1_ref[a * E:(a + 1) * E, :],
                            preferred_element_type=jnp.float32)
        h = jnp.maximum(h + b1_ref[...], 0.0)                        # ReLU, f32

        # attn2 on the lane-padded (E, 128) weight; padded logits carry a -1e30
        # bias so their softmax weight is exactly zero.
        logits = jnp.dot(h.astype(compute_dtype), w2_ref[...],
                         preferred_element_type=jnp.float32) + b2_ref[...]
        m = jnp.max(logits, axis=-1, keepdims=True)
        e = jnp.exp(logits - m)
        denom = jnp.sum(e, axis=-1, keepdims=True)
        attn = e * pl.reciprocal(denom, approx=True)                 # EUP vrcp

        # weighted sum of per-agent results over the real A lanes
        out_ref[...] = jnp.sum(r_ref[...] * attn[:, :A], axis=-1, keepdims=True)

    return kernel


def chair_forward(diff_list, r_list, params, *, block_b=256,
                  compute_dtype=jnp.bfloat16, lanes=128):
    """diff_list: list of A arrays (B, E); r_list: list of A arrays (B, 1)."""
    w1, b1, w2, b2 = params
    A = len(diff_list)
    B, E = diff_list[0].shape
    assert w1.shape == (A * E, E)

    # --- pad the tiny agent axis of attn2 to a full 128-lane width -----------
    A_pad = _round_up(max(A, lanes), lanes)
    w2_p = jnp.zeros((E, A_pad), jnp.float32).at[:, :A].set(w2.reshape(E, A))
    b2_p = jnp.full((1, A_pad), -1e30, jnp.float32).at[:, :A].set(
        b2.reshape(1, A).astype(jnp.float32))

    # --- batch tiling ---------------------------------------------------------
    block_b = max(16, _round_up(block_b, 16))            # bf16 sublane packing
    TB = min(block_b, _round_up(B, 16))
    B_pad = _round_up(B, TB)
    nb = B_pad // TB

    def pad_rows(x):
        if x.shape[0] == B_pad:
            return x
        return jnp.pad(x, ((0, B_pad - x.shape[0]), (0, 0)))

    diffs = [pad_rows(d).astype(compute_dtype) for d in diff_list]
    r = pad_rows(jnp.concatenate(r_list, axis=-1).astype(jnp.float32))  # (B_pad, A)

    w1c = w1.astype(compute_dtype)                        # (A*E, E)
    b1c = b1.reshape(1, E).astype(jnp.float32)            # (1, E)
    w2c = w2_p.astype(compute_dtype)                      # (E, A_pad)

    kernel = _make_chair_kernel(A, E, compute_dtype)

    in_specs = (
        [pl.BlockSpec((TB, E), lambda i: (i, 0)) for _ in range(A)]     # diff_a tiles
        + [pl.BlockSpec((A * E, E), lambda i: (0, 0)),                  # w1 (resident)
           pl.BlockSpec((1, E), lambda i: (0, 0)),                      # b1
           pl.BlockSpec((E, A_pad), lambda i: (0, 0)),                  # w2 (padded)
           pl.BlockSpec((1, A_pad), lambda i: (0, 0)),                  # b2 (padded)
           pl.BlockSpec((TB, A), lambda i: (i, 0))]                     # r tile
    )

    out = pl.pallas_call(
        kernel,
        out_shape=jax.ShapeDtypeStruct((B_pad, 1), jnp.float32),
        grid=(nb,),
        in_specs=in_specs,
        out_specs=pl.BlockSpec((TB, 1), lambda i: (i, 0)),
        compiler_params=pltpu.CompilerParams(
            dimension_semantics=("parallel",),
            vmem_limit_bytes=32 * 1024 * 1024,
        ),
    )(*diffs, w1c, b1c, w2c, b2_p, r)

    return out[:B]


def init_params(key, agent_num, embed_size):
    """Deterministic synthetic init for attn1 / attn2 (weights stored as (in, out))."""
    k1, k2, k3, k4 = jax.random.split(key, 4)
    in1 = agent_num * embed_size
    w1 = jax.random.normal(k1, (in1, embed_size), jnp.float32) * (1.0 / jnp.sqrt(in1))
    b1 = jax.random.normal(k2, (1, embed_size), jnp.float32) * 0.01
    w2 = jax.random.normal(k3, (embed_size, agent_num), jnp.float32) * (1.0 / jnp.sqrt(embed_size))
    b2 = jax.random.normal(k4, (1, agent_num), jnp.float32) * 0.01
    return w1, b1, w2, b2


def reference_forward(diff_list, r_list, params, compute_dtype=jnp.bfloat16):
    """Pure-JAX reference mirroring the PyTorch module (same bf16 matmul inputs
    and f32 accumulation as the kernel)."""
    w1, b1, w2, b2 = params
    diff = jnp.concatenate([d.astype(compute_dtype) for d in diff_list], axis=-1)
    h = jnp.dot(diff, w1.astype(compute_dtype), preferred_element_type=jnp.float32)
    h = jnp.maximum(h + b1.reshape(1, -1).astype(jnp.float32), 0.0)
    logits = jnp.dot(h.astype(compute_dtype), w2.astype(compute_dtype),
                     preferred_element_type=jnp.float32) + b2.reshape(1, -1).astype(jnp.float32)
    attn = jax.nn.softmax(logits, axis=-1)
    result = 0.0
    for idx, score in enumerate(r_list):
        result = score * attn[:, idx:idx + 1] + result
    return result


if __name__ == "__main__":
    AGENT_NUM = 3
    EMBED_SIZE = 32     # small stand-in for the real 512 (kernel is shape-generic)
    BATCH = 200         # deliberately not a tile multiple: exercises batch padding

    key = jax.random.PRNGKey(0)
    kp, kd, kr = jax.random.split(key, 3)

    params = init_params(kp, AGENT_NUM, EMBED_SIZE)

    dkeys = jax.random.split(kd, AGENT_NUM)
    rkeys = jax.random.split(kr, AGENT_NUM)
    diff_list = [jax.random.normal(dkeys[i], (BATCH, EMBED_SIZE), jnp.float32)
                 for i in range(AGENT_NUM)]
    r_list = [jax.random.normal(rkeys[i], (BATCH, 1), jnp.float32)
              for i in range(AGENT_NUM)]

    out = chair_forward(diff_list, r_list, params, block_b=128)   # grid = (2,), pads 200->256
    out = jax.block_until_ready(out)

    ref = reference_forward(diff_list, r_list, params)
    assert out.shape == (BATCH, 1)
    assert jnp.allclose(out, ref, atol=5e-3, rtol=5e-3), "mismatch vs. reference"

    print("KERNEL_OK")
</pallas_src>

<mosaic_0001>
module attributes {stable_mosaic.version = 11 : i64} {
  func.func @kernel(%arg0: i32, %arg1: memref<128x32xbf16, #tpu.memory_space<vmem>>, %arg2: memref<128x32xbf16, #tpu.memory_space<vmem>>, %arg3: memref<128x32xbf16, #tpu.memory_space<vmem>>, %arg4: memref<96x32xbf16, #tpu.memory_space<vmem>>, %arg5: memref<1x32xf32, #tpu.memory_space<vmem>>, %arg6: memref<32x128xbf16, #tpu.memory_space<vmem>>, %arg7: memref<1x128xf32, #tpu.memory_space<vmem>>, %arg8: memref<128x3xf32, #tpu.memory_space<vmem>>, %arg9: memref<128x1xf32, #tpu.memory_space<vmem>>) attributes {dimension_semantics = [#tpu.dimension_semantics<parallel>], iteration_bounds = array<i64: 2>, scalar_prefetch = 0 : i64, scratch_operands = 0 : i64, tpu.core_type = #tpu.core_type<tc>, window_params = [{transform_indices = @transform_0, window_bounds = array<i64: 128, 32>}, {transform_indices = @transform_1, window_bounds = array<i64: 128, 32>}, {transform_indices = @transform_2, window_bounds = array<i64: 128, 32>}, {pipeline_mode = #tpu.pipeline_mode<synchronous>, transform_indices = @transform_3, window_bounds = array<i64: 96, 32>}, {pipeline_mode = #tpu.pipeline_mode<synchronous>, transform_indices = @transform_4, window_bounds = array<i64: 1, 32>}, {pipeline_mode = #tpu.pipeline_mode<synchronous>, transform_indices = @transform_5, window_bounds = array<i64: 32, 128>}, {pipeline_mode = #tpu.pipeline_mode<synchronous>, transform_indices = @transform_6, window_bounds = array<i64: 1, 128>}, {transform_indices = @transform_7, window_bounds = array<i64: 128, 3>}, {transform_indices = @transform_8, window_bounds = array<i64: 128, 1>}]} {
    %c0 = arith.constant 0 : index
    %c0_0 = arith.constant 0 : index
    %0 = vector.load %arg1[%c0, %c0_0] : memref<128x32xbf16, #tpu.memory_space<vmem>>, vector<128x32xbf16>
    %c0_1 = arith.constant 0 : index
    %c0_2 = arith.constant 0 : index
    %1 = vector.load %arg4[%c0_1, %c0_2] : memref<96x32xbf16, #tpu.memory_space<vmem>>, vector<32x32xbf16>
    %cst = arith.constant dense<0.000000e+00> : vector<128x32xf32>
    %2 = tpu.matmul %0, %1, %cst {dimension_numbers = #tpu.dot_dimension_numbers<[1], [0], [0], [1], [0, 0, 1, 1], [], []>} : vector<128x32xbf16>, vector<32x32xbf16>, vector<128x32xf32> -> vector<128x32xf32>
    %c0_3 = arith.constant 0 : index
    %c0_4 = arith.constant 0 : index
    %3 = vector.load %arg2[%c0_3, %c0_4] : memref<128x32xbf16, #tpu.memory_space<vmem>>, vector<128x32xbf16>
    %c32 = arith.constant 32 : index
    %c0_5 = arith.constant 0 : index
    %4 = vector.load %arg4[%c32, %c0_5] : memref<96x32xbf16, #tpu.memory_space<vmem>>, vector<32x32xbf16>
    %cst_6 = arith.constant dense<0.000000e+00> : vector<128x32xf32>
    %5 = tpu.matmul %3, %4, %cst_6 {dimension_numbers = #tpu.dot_dimension_numbers<[1], [0], [0], [1], [0, 0, 1, 1], [], []>} : vector<128x32xbf16>, vector<32x32xbf16>, vector<128x32xf32> -> vector<128x32xf32>
    %6 = arith.addf %2, %5 : vector<128x32xf32>
    %c0_7 = arith.constant 0 : index
    %c0_8 = arith.constant 0 : index
    %7 = vector.load %arg3[%c0_7, %c0_8] : memref<128x32xbf16, #tpu.memory_space<vmem>>, vector<128x32xbf16>
    %c64 = arith.constant 64 : index
    %c0_9 = arith.constant 0 : index
    %8 = vector.load %arg4[%c64, %c0_9] : memref<96x32xbf16, #tpu.memory_space<vmem>>, vector<32x32xbf16>
    %cst_10 = arith.constant dense<0.000000e+00> : vector<128x32xf32>
    %9 = tpu.matmul %7, %8, %cst_10 {dimension_numbers = #tpu.dot_dimension_numbers<[1], [0], [0], [1], [0, 0, 1, 1], [], []>} : vector<128x32xbf16>, vector<32x32xbf16>, vector<128x32xf32> -> vector<128x32xf32>
    %10 = arith.addf %6, %9 : vector<128x32xf32>
    %c0_11 = arith.constant 0 : index
    %c0_12 = arith.constant 0 : index
    %11 = vector.load %arg5[%c0_11, %c0_12] : memref<1x32xf32, #tpu.memory_space<vmem>>, vector<1x32xf32>
    %12 = vector.broadcast %11 : vector<1x32xf32> to vector<128x32xf32>
    %13 = arith.addf %10, %12 : vector<128x32xf32>
    %cst_13 = arith.constant 0.000000e+00 : f32
    %14 = vector.broadcast %cst_13 : f32 to vector<128x32xf32>
    %15 = arith.maximumf %13, %14 : vector<128x32xf32>
    %16 = arith.truncf %15 : vector<128x32xf32> to vector<128x32xbf16>
    %c0_14 = arith.constant 0 : index
    %c0_15 = arith.constant 0 : index
    %17 = vector.load %arg6[%c0_14, %c0_15] : memref<32x128xbf16, #tpu.memory_space<vmem>>, vector<32x128xbf16>
    %cst_16 = arith.constant dense<0.000000e+00> : vector<128x128xf32>
    %18 = tpu.matmul %16, %17, %cst_16 {dimension_numbers = #tpu.dot_dimension_numbers<[1], [0], [0], [1], [0, 0, 1, 1], [], []>} : vector<128x32xbf16>, vector<32x128xbf16>, vector<128x128xf32> -> vector<128x128xf32>
    %c0_17 = arith.constant 0 : index
    %c0_18 = arith.constant 0 : index
    %19 = vector.load %arg7[%c0_17, %c0_18] : memref<1x128xf32, #tpu.memory_space<vmem>>, vector<1x128xf32>
    %20 = vector.broadcast %19 : vector<1x128xf32> to vector<128x128xf32>
    %21 = arith.addf %18, %20 : vector<128x128xf32>
    %cst_19 = arith.constant dense<0xFF800000> : vector<128xf32>
    %22 = vector.multi_reduction <maximumf>, %21, %cst_19 [1] : vector<128x128xf32> to vector<128xf32>
    %23 = vector.shape_cast %22 : vector<128xf32> to vector<128x1xf32>
    %24 = vector.broadcast %23 : vector<128x1xf32> to vector<128x128xf32>
    %25 = arith.subf %21, %24 : vector<128x128xf32>
    %26 = math.exp %25 : vector<128x128xf32>
    %cst_20 = arith.constant dense<0.000000e+00> : vector<128xf32>
    %27 = vector.multi_reduction <add>, %26, %cst_20 [1] : vector<128x128xf32> to vector<128xf32>
    %28 = vector.shape_cast %27 : vector<128xf32> to vector<128x1xf32>
    %29 = tpu.reciprocal %28 {approx = true} : vector<128x1xf32> -> vector<128x1xf32>
    %30 = vector.broadcast %29 : vector<128x1xf32> to vector<128x128xf32>
    %31 = arith.mulf %26, %30 : vector<128x128xf32>
    %c0_21 = arith.constant 0 : index
    %c0_22 = arith.constant 0 : index
    %32 = vector.load %arg8[%c0_21, %c0_22] : memref<128x3xf32, #tpu.memory_space<vmem>>, vector<128x3xf32>
    %33 = vector.extract_strided_slice %31 {offsets = [0, 0], sizes = [128, 3], strides = [1, 1]} : vector<128x128xf32> to vector<128x3xf32>
    %34 = arith.mulf %32, %33 : vector<128x3xf32>
    %cst_23 = arith.constant dense<0.000000e+00> : vector<128xf32>
    %35 = vector.multi_reduction <add>, %34, %cst_23 [1] : vector<128x3xf32> to vector<128xf32>
    %36 = vector.shape_cast %35 : vector<128xf32> to vector<128x1xf32>
    %c0_24 = arith.constant 0 : index
    %c0_25 = arith.constant 0 : index
    %37 = vector.load %arg9[%c0_24, %c0_25] : memref<128x1xf32, #tpu.memory_space<vmem>>, vector<128x1xf32>
    tpu.vector_store %arg9[%c0_24, %c0_25], %36 {strides = array<i32>} : memref<128x1xf32, #tpu.memory_space<vmem>>, vector<128x1xf32>,
    return
  }
  func.func @transform_0(%arg0: i32) -> (i32, i32) {
    %c0_i32 = arith.constant 0 : i32
    %c0_i32_0 = arith.constant 0 : i32
    return %arg0, %c0_i32 : i32, i32
  }
  func.func @transform_1(%arg0: i32) -> (i32, i32) {
    %c0_i32 = arith.constant 0 : i32
    %c0_i32_0 = arith.constant 0 : i32
    return %arg0, %c0_i32 : i32, i32
  }
  func.func @transform_2(%arg0: i32) -> (i32, i32) {
    %c0_i32 = arith.constant 0 : i32
    %c0_i32_0 = arith.constant 0 : i32
    return %arg0, %c0_i32 : i32, i32
  }
  func.func @transform_3(%arg0: i32) -> (i32, i32) {
    %c0_i32 = arith.constant 0 : i32
    %c0_i32_0 = arith.constant 0 : i32
    %c0_i32_1 = arith.constant 0 : i32
    return %c0_i32, %c0_i32_0 : i32, i32
  }
  func.func @transform_4(%arg0: i32) -> (i32, i32) {
    %c0_i32 = arith.constant 0 : i32
    %c0_i32_0 = arith.constant 0 : i32
    %c0_i32_1 = arith.constant 0 : i32
    return %c0_i32, %c0_i32_0 : i32, i32
  }
  func.func @transform_5(%arg0: i32) -> (i32, i32) {
    %c0_i32 = arith.constant 0 : i32
    %c0_i32_0 = arith.constant 0 : i32
    %c0_i32_1 = arith.constant 0 : i32
    return %c0_i32, %c0_i32_0 : i32, i32
  }
  func.func @transform_6(%arg0: i32) -> (i32, i32) {
    %c0_i32 = arith.constant 0 : i32
    %c0_i32_0 = arith.constant 0 : i32
    %c0_i32_1 = arith.constant 0 : i32
    return %c0_i32, %c0_i32_0 : i32, i32
  }
  func.func @transform_7(%arg0: i32) -> (i32, i32) {
    %c0_i32 = arith.constant 0 : i32
    %c0_i32_0 = arith.constant 0 : i32
    return %arg0, %c0_i32 : i32, i32
  }
  func.func @transform_8(%arg0: i32) -> (i32, i32) {
    %c0_i32 = arith.constant 0 : i32
    %c0_i32_0 = arith.constant 0 : i32
    return %arg0, %c0_i32 : i32, i32
  }
}

</mosaic_0001>

<bundles_post_ra>
// kernel: tpu_custom_call.1
= control target key start
LH: loop header
LB: loop body
LE: loop exit
PB: predicated region body
PF: predicated region fallthrough
CT: control target
= control target key end

     0   :  { %s1635_s27 = smov 0   ;;  %s1955_s0 = inlined_call_operand.vmem [shape: bf16[256,32], index: 0, kind: input, shape index: {}]   ;;  %s1956_s1 = inlined_call_operand.vmem [shape: bf16[256,32], index: 1, kind: input, shape index: {}]   ;;  %s1957_s2 = inlined_call_operand.vmem [shape: bf16[256,32], index: 2, kind: input, shape index: {}]   ;;  %s1958_s3 = inlined_call_operand.vmem [shape: bf16[96,32], index: 3, kind: input, shape index: {}]   ;;  %s1959_s4 = inlined_call_operand.vmem [shape: f32[1,32], index: 4, kind: input, shape index: {}]   ;;  %s1960_s5 = inlined_call_operand.vmem [shape: bf16[32,128], index: 5, kind: input, shape index: {}]   ;;  %s1961_s6 = inlined_call_operand.vmem [shape: f32[1,128], index: 6, kind: input, shape index: {}]   ;;  %s1962_s7 = inlined_call_operand.vmem [shape: f32[256,3], index: 7, kind: input, shape index: {}]   ;;  %s1963_s8 = inlined_call_operand.vmem [shape: f32[256,1], index: 8, kind: output, shape index: {}]  }
   0x1 LB: > { %s1299_s28 = sadd.s32 4294967295, %s1588_s27   ;;  %p1303_p0 = scmp.ge.s32.totalorder %s1588_s27, 1  ;;  %s1588_s27 = sphi %s1635_s27, %s18_s27  }
   0x2   : > { %p296_p1 = scmp.lt.s32.totalorder %s1588_s27, 3 }
   0x4   : > { %p297_p2 = pnand %p1303_p0, %p296_p1 }
   0x5   : > { %s1304_s13 = sshll.u32 (!%p297_p2), %s1299_s28, 4 }
   0x6   : > { %300 = sbr.rel (%p297_p2) target bundleno = 794 (0x31a), region = 52  ;;  %p346_p3 = scmp.lt.s32.totalorder (!%p297_p2), %s1304_s13, 31 }
   0xb   : > { %v1495_v0 = vld [vmem:[%s1958_s3 + $0x18] sm:$0xff]  ;;  %v1485_v1 = vld [vmem:[%s1958_s3 + $0x8] sm:$0xff]  ;;  %v1494_v3 = vld [vmem:[%s1958_s3 + $0x10] sm:$0xff]  ;;  %s1965_s13 = smov (!%p346_p3, %s1304_s13), 31  ;;  %vm468_vm0 = vcmask 261120   ;;  %vm1141_vm1 = vcmask 23552  }
   0xc   : > { %v1505_v2 = vld [vmem:[%s1958_s3 + $0x28] sm:$0xff]  ;;  %499 = vmatpush.bf16.msra.mxu0 %v1495_v0  ;;  %624 = vmatpush.bf16.msra.mxu1 %v1485_v1  ;;  %v1484_v4 = vld [vmem:[%s1958_s3] sm:$0xff]  ;;  %s1305_s20 = sshll.u32 %s1965_s13, 2  ;;  %s1311_s18 = sshll.u32 %s1965_s13, 3  ;;  %vm1190_vm2 = vcmask 7168  }
   0xd   : > { %769 = vmatpush.bf16.msra.mxu2 %v1505_v2  ;;  %v1504_v5 = vld [vmem:[%s1958_s3 + $0x20] sm:$0xff]  ;;  %s1667_s23 = scalar_lea.vmem %s1956_s1, %s1305_s20  ;;  %s1672_s26 = scalar_lea.vmem %s1955_s0, %s1305_s20  ;;  %v1507_v29 = vld [vmem:[%s1960_s5 + $0x8] sm:$0xff] }
   0xe   : > { %v1486_v6 = vld [vmem:[%s1667_s23] sm:$0xff]  ;;  %s1679_s30 = scalar_lea.vmem %s1957_s2, %s1305_s20  ;;  %v1487_v9 = vld [vmem:[%s1667_s23 + $0x8] sm:$0xff]  ;;  %v1488_v12 = vld [vmem:[%s1667_s23 + $0x10] sm:$0xff]  ;;  %922 = vmatpush.bf16.msra.mxu3 %v1507_v29  ;;  %s1862_s21 = scalar_lea.vmem %s1962_s7, %s1311_s18 }
   0xf   : > { %v1476_v7 = vld [vmem:[%s1672_s26] sm:$0xff]  ;;  %v1477_v10 = vld [vmem:[%s1672_s26 + $0x8] sm:$0xff]  ;;  %v1478_v13 = vld [vmem:[%s1672_s26 + $0x10] sm:$0xff]  ;;  %s1915_s24 = scalar_lea.vmem %s1963_s8, %s1311_s18 }
  0x10   : > { %500 = vmatpush.bf16.msra.mxu0 %v1494_v3  ;;  %625 = vmatpush.bf16.msra.mxu1 %v1484_v4  ;;  %v1496_v8 = vld [vmem:[%s1679_s30] sm:$0xff]  ;;  %v1497_v11 = vld [vmem:[%s1679_s30 + $0x8] sm:$0xff]  ;;  %v1498_v14 = vld [vmem:[%s1679_s30 + $0x10] sm:$0xff] }
  0x11   : > { %770 = vmatpush.bf16.msra.mxu2 %v1504_v5  ;;  %v1489_v15 = vld [vmem:[%s1667_s23 + $0x18] sm:$0xff]  ;;  %v1490_v18 = vld [vmem:[%s1667_s23 + $0x20] sm:$0xff]  ;;  %v1491_v21 = vld [vmem:[%s1667_s23 + $0x28] sm:$0xff] }
  0x12   : > { %v1479_v16 = vld [vmem:[%s1672_s26 + $0x18] sm:$0xff]  ;;  %v1480_v19 = vld [vmem:[%s1672_s26 + $0x20] sm:$0xff]  ;;  %v1481_v22 = vld [vmem:[%s1672_s26 + $0x28] sm:$0xff] }
  0x13   : > { %1354 = vmatmul.msk.bf16.vlgmr.msra.gmra.mxu0 %vm468_vm0, %v1486_v6  ;;  %1402 = vmatmul.msk.bf16.vlgmr.msra.gmra.mxu1 %vm468_vm0, %v1476_v7  ;;  %v1499_v17 = vld [vmem:[%s1679_s30 + $0x18] sm:$0xff]  ;;  %v1500_v20 = vld [vmem:[%s1679_s30 + $0x20] sm:$0xff]  ;;  %v1501_v23 = vld [vmem:[%s1679_s30 + $0x28] sm:$0xff] }
  0x14   : > { %1450 = vmatmul.msk.bf16.vlgmr.msra.gmra.mxu2 %vm468_vm0, %v1496_v8  ;;  %v1492_v24 = vld [vmem:[%s1667_s23 + $0x30] sm:$0xff]  ;;  %v1493_v27 = vld [vmem:[%s1667_s23 + $0x38] sm:$0xff]  ;;  %v1506_v31 = vld [vmem:[%s1960_s5] sm:$0xff] }
  0x15   : > { %v1482_v25 = vld [vmem:[%s1672_s26 + $0x30] sm:$0xff]  ;;  %v1483_v28 = vld [vmem:[%s1672_s26 + $0x38] sm:$0xff]  ;;  %923 = vmatpush.bf16.msra.mxu3 %v1506_v31  ;;  %v1736_v39 = vld [vmem:[%s1959_s4] ss:$0 sm:$0xff] }
  0x16   : > { %v1502_v26 = vld [vmem:[%s1679_s30 + $0x30] sm:$0xff]  ;;  %v1503_v30 = vld [vmem:[%s1679_s30 + $0x38] sm:$0xff] }
  0x23   : > { %1355 = vmatmul.msk.bf16.gmra.mxu0 %vm468_vm0, %v1487_v9  ;;  %1403 = vmatmul.msk.bf16.gmra.mxu1 %vm468_vm0, %v1477_v10 }
  0x24   : > { %1451 = vmatmul.msk.bf16.gmra.mxu2 %vm468_vm0, %v1497_v11 }
  0x33   : > { %1356 = vmatmul.msk.bf16.gmra.mxu0 %vm468_vm0, %v1488_v12  ;;  %1404 = vmatmul.msk.bf16.gmra.mxu1 %vm468_vm0, %v1478_v13 }
  0x34   : > { %1452 = vmatmul.msk.bf16.gmra.mxu2 %vm468_vm0, %v1498_v14 }
  0x43   : > { %1357 = vmatmul.msk.bf16.gmra.mxu0 %vm468_vm0, %v1489_v15  ;;  %1405 = vmatmul.msk.bf16.gmra.mxu1 %vm468_vm0, %v1479_v16 }
  0x44   : > { %1453 = vmatmul.msk.bf16.gmra.mxu2 %vm468_vm0, %v1499_v17 }
  0x53   : > { %1358 = vmatmul.msk.bf16.gmra.mxu0 %vm468_vm0, %v1490_v18  ;;  %1406 = vmatmul.msk.bf16.gmra.mxu1 %vm468_vm0, %v1480_v19 }
  0x54   : > { %1454 = vmatmul.msk.bf16.gmra.mxu2 %vm468_vm0, %v1500_v20 }
  0x63   : > { %1359 = vmatmul.msk.bf16.gmra.mxu0 %vm468_vm0, %v1491_v21  ;;  %1407 = vmatmul.msk.bf16.gmra.mxu1 %vm468_vm0, %v1481_v22 }
  0x64   : > { %1455 = vmatmul.msk.bf16.gmra.mxu2 %vm468_vm0, %v1501_v23 }
  0x73   : > { %1360 = vmatmul.msk.bf16.gmra.mxu0 %vm468_vm0, %v1492_v24  ;;  %1408 = vmatmul.msk.bf16.gmra.mxu1 %vm468_vm0, %v1482_v25 }
  0x74   : > { %1456 = vmatmul.msk.bf16.gmra.mxu2 %vm468_vm0, %v1502_v26 }
  0x83   : > { %1361 = vmatmul.msk.bf16.gmra.mxu0 %vm468_vm0, %v1493_v27  ;;  %1409 = vmatmul.msk.bf16.gmra.mxu1 %vm468_vm0, %v1483_v28 }
  0x84   : > { %1457 = vmatmul.msk.bf16.gmra.mxu2 %vm468_vm0, %v1503_v30 }
  0x90   : > { %v502_v32 = vpop.f32.mrf.mxu0  ;;  %v627_v33 = vpop.f32.mrf.mxu1 }
  0x91   : > { %v628_v35 = vadd.f32 %v627_v33, %v502_v32 }
  0x97   : > { %v772_v34 = vpop.f32.mrf.mxu2 }
  0x98   : > { %v504_v36 = vpop.f32.mrf.mxu0  ;;  %v629_v37 = vpop.f32.mrf.mxu1  ;;  %v812_v38 = vadd.f32 %v772_v34, %v628_v35 }
  0x99   : > { %v630_v40 = vadd.f32 %v629_v37, %v504_v36 }
  0x9a   : > { %v832_v42 = vadd.f32 %v1736_v39, %v812_v38 }
  0x9c   : > { %v848_v47 = vmax.f32 %v832_v42, 0.0 }
  0x9f   : > { %v774_v41 = vpop.f32.mrf.mxu2 }
  0xa0   : > { %v813_v43 = vadd.f32 %v774_v41, %v630_v40  ;;  %v507_v44 = vpop.f32.mrf.mxu0  ;;  %v632_v45 = vpop.f32.mrf.mxu1 }
  0xa1   : > { %v633_v51 = vadd.f32 %v632_v45, %v507_v44 }
  0xa2   : > { %v833_v46 = vadd.f32 %v1736_v39, %v813_v43 }
  0xa4   : > { %v849_v48 = vmax.f32 %v833_v46, 0.0 }
  0xa6   : > { %v864_v49 = vpack.c.bf16 %v849_v48, %v848_v47 }
  0xa7   : > { %v777_v50 = vpop.f32.mrf.mxu2 }
  0xa8   : > { %1466 = vmatmul.msk.bf16.vlgmr.msra.gmra.mxu3 %vm468_vm0, %v864_v49  ;;  %v509_v52 = vpop.f32.mrf.mxu0  ;;  %v634_v53 = vpop.f32.mrf.mxu1  ;;  %v814_v54 = vadd.f32 %v777_v50, %v633_v51 }
  0xa9   : > { %v635_v55 = vadd.f32 %v634_v53, %v509_v52 }
  0xaa   : > { %v834_v57 = vadd.f32 %v1736_v39, %v814_v54 }
  0xac   : > { %v850_v62 = vmax.f32 %v834_v57, 0.0 }
  0xaf   : > { %v779_v56 = vpop.f32.mrf.mxu2 }
  0xb0   : > { %v815_v58 = vadd.f32 %v779_v56, %v635_v55  ;;  %v512_v59 = vpop.f32.mrf.mxu0  ;;  %v637_v60 = vpop.f32.mrf.mxu1 }
  0xb1   : > { %v638_v2 = vadd.f32 %v637_v60, %v512_v59 }
  0xb2   : > { %v835_v61 = vadd.f32 %v1736_v39, %v815_v58 }
  0xb4   : > { %v851_v63 = vmax.f32 %v835_v61, 0.0 }
  0xb6   : > { %v865_v0 = vpack.c.bf16 %v851_v63, %v850_v62 }
  0xb7   : > { %v782_v1 = vpop.f32.mrf.mxu2 }
  0xb8   : > { %1467 = vmatmul.msk.bf16.gmra.mxu3 %vm468_vm0, %v865_v0  ;;  %v514_v3 = vpop.f32.mrf.mxu0  ;;  %v639_v4 = vpop.f32.mrf.mxu1  ;;  %v816_v5 = vadd.f32 %v782_v1, %v638_v2 }
  0xb9   : > { %v640_v6 = vadd.f32 %v639_v4, %v514_v3 }
  0xba   : > { %v836_v8 = vadd.f32 %v1736_v39, %v816_v5 }
  0xbc   : > { %v852_v13 = vmax.f32 %v836_v8, 0.0 }
  0xbf   : > { %v784_v7 = vpop.f32.mrf.mxu2 }
  0xc0   : > { %v817_v9 = vadd.f32 %v784_v7, %v640_v6  ;;  %v517_v10 = vpop.f32.mrf.mxu0  ;;  %v642_v11 = vpop.f32.mrf.mxu1 }
  0xc1   : > { %v643_v17 = vadd.f32 %v642_v11, %v517_v10 }
  0xc2   : > { %v837_v12 = vadd.f32 %v1736_v39, %v817_v9 }
  0xc4   : > { %v853_v14 = vmax.f32 %v837_v12, 0.0 }
  0xc6   : > { %v866_v15 = vpack.c.bf16 %v853_v14, %v852_v13 }
  0xc7   : > { %v787_v16 = vpop.f32.mrf.mxu2 }
  0xc8   : > { %1468 = vmatmul.msk.bf16.gmra.mxu3 %vm468_vm0, %v866_v15  ;;  %v519_v18 = vpop.f32.mrf.mxu0  ;;  %v644_v19 = vpop.f32.mrf.mxu1  ;;  %v818_v20 = vadd.f32 %v787_v16, %v643_v17 }
  0xc9   : > { %v645_v21 = vadd.f32 %v644_v19, %v519_v18 }
  0xca   : > { %v838_v23 = vadd.f32 %v1736_v39, %v818_v20 }
  0xcc   : > { %v854_v28 = vmax.f32 %v838_v23, 0.0 }
  0xcf   : > { %v789_v22 = vpop.f32.mrf.mxu2 }
  0xd0   : > { %v819_v24 = vadd.f32 %v789_v22, %v645_v21  ;;  %v522_v25 = vpop.f32.mrf.mxu0  ;;  %v647_v26 = vpop.f32.mrf.mxu1 }
  0xd1   : > { %v648_v32 = vadd.f32 %v647_v26, %v522_v25  ;;  %v1517_v26 = vld [vmem:[%s1961_s6] ss:$0 sm:$0xff] }
  0xd2   : > { %v839_v27 = vadd.f32 %v1736_v39, %v819_v24 }
  0xd4   : > { %v855_v29 = vmax.f32 %v839_v27, 0.0 }
  0xd6   : > { %v867_v30 = vpack.c.bf16 %v855_v29, %v854_v28 }
  0xd7   : > { %v792_v31 = vpop.f32.mrf.mxu2 }
  0xd8   : > { %1469 = vmatmul.msk.bf16.gmra.mxu3 %vm468_vm0, %v867_v30  ;;  %v524_v33 = vpop.f32.mrf.mxu0  ;;  %v649_v34 = vpop.f32.mrf.mxu1  ;;  %v820_v35 = vadd.f32 %v792_v31, %v648_v32 }
  0xd9   : > { %v650_v36 = vadd.f32 %v649_v34, %v524_v33 }
  0xda   : > { %v840_v38 = vadd.f32 %v1736_v39, %v820_v35 }
  0xdc   : > { %v856_v44 = vmax.f32 %v840_v38, 0.0 }
  0xdf   : > { %v794_v37 = vpop.f32.mrf.mxu2 }
  0xe0   : > { %v821_v40 = vadd.f32 %v794_v37, %v650_v36  ;;  %v527_v41 = vpop.f32.mrf.mxu0  ;;  %v652_v42 = vpop.f32.mrf.mxu1 }
  0xe1   : > { %v653_v48 = vadd.f32 %v652_v42, %v527_v41 }
  0xe2   : > { %v841_v43 = vadd.f32 %v1736_v39, %v821_v40 }
  0xe4   : > { %v857_v45 = vmax.f32 %v841_v43, 0.0 }
  0xe6   : > { %v868_v46 = vpack.c.bf16 %v857_v45, %v856_v44 }
  0xe7   : > { %v797_v47 = vpop.f32.mrf.mxu2 }
  0xe8   : > { %1470 = vmatmul.msk.bf16.gmra.mxu3 %vm468_vm0, %v868_v46  ;;  %v529_v49 = vpop.f32.mrf.mxu0  ;;  %v654_v50 = vpop.f32.mrf.mxu1  ;;  %v822_v51 = vadd.f32 %v797_v47, %v653_v48 }
  0xe9   : > { %v655_v52 = vadd.f32 %v654_v50, %v529_v49 }
  0xea   : > { %v842_v54 = vadd.f32 %v1736_v39, %v822_v51 }
  0xec   : > { %v858_v59 = vmax.f32 %v842_v54, 0.0 }
  0xef   : > { %v799_v53 = vpop.f32.mrf.mxu2 }
  0xf0   : > { %v823_v55 = vadd.f32 %v799_v53, %v655_v52  ;;  %v532_v56 = vpop.f32.mrf.mxu0  ;;  %v657_v57 = vpop.f32.mrf.mxu1 }
  0xf1   : > { %v658_v63 = vadd.f32 %v657_v57, %v532_v56 }
  0xf2   : > { %v843_v58 = vadd.f32 %v1736_v39, %v823_v55 }
  0xf4   : > { %v859_v60 = vmax.f32 %v843_v58, 0.0 }
  0xf6   : > { %v869_v61 = vpack.c.bf16 %v859_v60, %v858_v59 }
  0xf7   : > { %v802_v62 = vpop.f32.mrf.mxu2 }
  0xf8   : > { %1471 = vmatmul.msk.bf16.gmra.mxu3 %vm468_vm0, %v869_v61  ;;  %v534_v0 = vpop.f32.mrf.mxu0  ;;  %v659_v1 = vpop.f32.mrf.mxu1  ;;  %v824_v2 = vadd.f32 %v802_v62, %v658_v63 }
  0xf9   : > { %v660_v3 = vadd.f32 %v659_v1, %v534_v0 }
  0xfa   : > { %v844_v5 = vadd.f32 %v1736_v39, %v824_v2 }
  0xfc   : > { %v860_v10 = vmax.f32 %v844_v5, 0.0 }
  0xff   : > { %v804_v4 = vpop.f32.mrf.mxu2 }
 0x100   : > { %v825_v6 = vadd.f32 %v804_v4, %v660_v3  ;;  %v537_v7 = vpop.f32.mrf.mxu0  ;;  %v662_v8 = vpop.f32.mrf.mxu1 }
 0x101   : > { %v663_v14 = vadd.f32 %v662_v8, %v537_v7 }
 0x102   : > { %v845_v9 = vadd.f32 %v1736_v39, %v825_v6 }
 0x104   : > { %v861_v11 = vmax.f32 %v845_v9, 0.0 }
 0x106   : > { %v870_v12 = vpack.c.bf16 %v861_v11, %v860_v10 }
 0x107   : > { %v807_v13 = vpop.f32.mrf.mxu2 }
 0x108   : > { %1472 = vmatmul.msk.bf16.gmra.mxu3 %vm468_vm0, %v870_v12  ;;  %v539_v15 = vpop.f32.mrf.mxu0  ;;  %v664_v16 = vpop.f32.mrf.mxu1  ;;  %v826_v17 = vadd.f32 %v807_v13, %v663_v14 }
 0x109   : > { %v665_v18 = vadd.f32 %v664_v16, %v539_v15 }
 0x10a   : > { %v846_v20 = vadd.f32 %v1736_v39, %v826_v17 }
 0x10c   : > { %v862_v23 = vmax.f32 %v846_v20, 0.0 }
 0x10f   : > { %v809_v19 = vpop.f32.mrf.mxu2 }
 0x110   : > { %v827_v21 = vadd.f32 %v809_v19, %v665_v18 }
 0x112   : > { %v847_v22 = vadd.f32 %v1736_v39, %v827_v21 }
 0x114   : > { %v863_v24 = vmax.f32 %v847_v22, 0.0 }
 0x116   : > { %v871_v25 = vpack.c.bf16 %v863_v24, %v862_v23 }
 0x118   : > { %1473 = vmatmul.msk.bf16.gmra.mxu3 %vm468_vm0, %v871_v25 }
 0x12b   : > { %v925_v27 = vpop.f32.mrf.mxu3 }
 0x12c   : > { %v926_v28 = vadd.f32 %v1517_v26, %v925_v27 }
 0x12e   : > { %965 = vmax.xlane.f32.xlu0 %v926_v28 }
 0x133   : > { %v927_v29 = vpop.f32.mrf.mxu3 }
 0x134   : > { %v928_v30 = vadd.f32 %v1517_v26, %v927_v29 }
 0x136   : > { %967 = vmax.xlane.f32.xlu0 %v928_v30 }
 0x13b   : > { %v930_v31 = vpop.f32.mrf.mxu3 }
 0x13c   : > { %v931_v32 = vadd.f32 %v1517_v26, %v930_v31 }
 0x13e   : > { %969 = vmax.xlane.f32.xlu1 %v931_v32 }
 0x143   : > { %v932_v33 = vpop.f32.mrf.mxu3 }
 0x144   : > { %v933_v39 = vadd.f32 %v1517_v26, %v932_v33 }
 0x146   : > { %971 = vmax.xlane.f32.xlu1 %v933_v39 }
 0x14b   : > { %v935_v34 = vpop.f32.mrf.mxu3 }
 0x14c   : > { %v936_v35 = vadd.f32 %v1517_v26, %v935_v34 }
 0x14e   : > { %973 = vmax.xlane.f32.xlu2 %v936_v35 }
 0x153   : > { %v937_v36 = vpop.f32.mrf.mxu3 }
 0x154   : > { %v1765_v37 = vadd.f32 %v1517_v26, %v937_v36 }
 0x156   : > { %975 = vmax.xlane.f32.xlu2 %v1765_v37 }
 0x15b   : > { %v940_v38 = vpop.f32.mrf.mxu3 }
 0x15c   : > { %v1768_v40 = vadd.f32 %v1517_v26, %v940_v38 }
 0x15e   : > { %977 = vmax.xlane.f32.xlu0 %v1768_v40 }
 0x163   : > { %v942_v41 = vpop.f32.mrf.mxu3 }
 0x164   : > { %v1771_v42 = vadd.f32 %v1517_v26, %v942_v41 }
 0x166   : > { %979 = vmax.xlane.f32.xlu1 %v1771_v42 }
 0x16b   : > { %v945_v43 = vpop.f32.mrf.mxu3 }
 0x16c   : > { %v1774_v44 = vadd.f32 %v1517_v26, %v945_v43 }
 0x16e   : > { %981 = vmax.xlane.f32.xlu2 %v1774_v44 }
 0x173   : > { %v947_v45 = vpop.f32.mrf.mxu3 }
 0x174   : > { %v1777_v46 = vadd.f32 %v1517_v26, %v947_v45 }
 0x176   : > { %983 = vmax.xlane.f32.xlu0 %v1777_v46 }
 0x17b   : > { %v950_v47 = vpop.f32.mrf.mxu3 }
 0x17c   : > { %v1780_v48 = vadd.f32 %v1517_v26, %v950_v47 }
 0x17e   : > { %985 = vmax.xlane.f32.xlu1 %v1780_v48 }
 0x183   : > { %v952_v49 = vpop.f32.mrf.mxu3 }
 0x184   : > { %v1783_v50 = vadd.f32 %v1517_v26, %v952_v49 }
 0x186   : > { %987 = vmax.xlane.f32.xlu2 %v1783_v50 }
 0x18b   : > { %v955_v51 = vpop.f32.mrf.mxu3 }
 0x18c   : > { %v1786_v52 = vadd.f32 %v1517_v26, %v955_v51 }
 0x18e   : > { %989 = vmax.xlane.f32.xlu0 %v1786_v52 }
 0x193   : > { %v957_v53 = vpop.f32.mrf.mxu3 }
 0x194   : > { %v1789_v54 = vadd.f32 %v1517_v26, %v957_v53 }
 0x196   : > { %991 = vmax.xlane.f32.xlu1 %v1789_v54 }
 0x19b   : > { %v960_v55 = vpop.f32.mrf.mxu3 }
 0x19c   : > { %v1792_v56 = vadd.f32 %v1517_v26, %v960_v55 }
 0x19e   : > { %993 = vmax.xlane.f32.xlu2 %v1792_v56 }
 0x1a1   : > { %v966_v57 = vpop.xlane.xlu0 %965 }
 0x1a2   : > { %v997_v58 = vsub.f32 %v926_v28, %v966_v57 }
 0x1a3   : > { %v962_v59 = vpop.f32.mrf.mxu3 }
 0x1a4   : > { %v1013_v60 = vmul.f32 1.442695, %v997_v58  ;;  %v1795_v61 = vadd.f32 %v1517_v26, %v962_v59 }
 0x1a6   : > { %1518 = vpow2.f32 %v1013_v60  ;;  %995 = vmax.xlane.f32.xlu0 %v1795_v61 }
 0x1a9   : > { %v968_v62 = vpop.xlane.xlu0 %967 }
 0x1aa   : > { %v998_v63 = vsub.f32 %v928_v30, %v968_v62 }
 0x1ac   : > { %v1798_v0 = vpop.eup %1518  ;;  %v1015_v1 = vmul.f32 1.442695, %v998_v63 }
 0x1ad   : > { %1045 = vadd.xlane.f32.xlu1 %v1798_v0 }
 0x1ae   : > { %1520 = vpow2.f32 %v1015_v1 }
 0x1b1   : > { %v970_v2 = vpop.xlane.xlu1 %969 }
 0x1b2   : > { %v999_v3 = vsub.f32 %v931_v32, %v970_v2 }
 0x1b4   : > { %v1801_v4 = vpop.eup %1520  ;;  %v1017_v5 = vmul.f32 1.442695, %v999_v3 }
 0x1b5   : > { %1047 = vadd.xlane.f32.xlu2 %v1801_v4 }
 0x1b6   : > { %1522 = vpow2.f32 %v1017_v5  ;;  %v1110_v5 = vld [vmem:[%s1862_s21 + $0x8] sm:$0xff] }
 0x1b9   : > { %v972_v6 = vpop.xlane.xlu1 %971 }
 0x1ba   : > { %v1000_v7 = vsub.f32 %v933_v39, %v972_v6 }
 0x1bc   : > { %v1804_v8 = vpop.eup %1522  ;;  %v1019_v9 = vmul.f32 1.442695, %v1000_v7 }
 0x1bd   : > { %1049 = vadd.xlane.f32.xlu0 %v1804_v8 }
 0x1be   : > { %1524 = vpow2.f32 %v1019_v9 }
 0x1c1   : > { %v974_v10 = vpop.xlane.xlu2 %973 }
 0x1c2   : > { %v1001_v11 = vsub.f32 %v936_v35, %v974_v10 }
 0x1c4   : > { %v1807_v12 = vpop.eup %1524  ;;  %v1021_v13 = vmul.f32 1.442695, %v1001_v11 }
 0x1c5   : > { %1051 = vadd.xlane.f32.xlu1 %v1807_v12 }
 0x1c6   : > { %1526 = vpow2.f32 %v1021_v13  ;;  %v1111_v13 = vld [vmem:[%s1862_s21 + $0x10] sm:$0xff] }
 0x1c9   : > { %v976_v14 = vpop.xlane.xlu2 %975 }
 0x1ca   : > { %v1002_v15 = vsub.f32 %v1765_v37, %v976_v14 }
 0x1cc   : > { %v1811_v16 = vpop.eup %1526  ;;  %v1023_v17 = vmul.f32 1.442695, %v1002_v15 }
 0x1cd   : > { %1053 = vadd.xlane.f32.xlu2 %v1811_v16 }
 0x1ce   : > { %1528 = vpow2.f32 %v1023_v17 }
 0x1d1   : > { %v978_v18 = vpop.xlane.xlu0 %977 }
 0x1d2   : > { %v1003_v19 = vsub.f32 %v1768_v40, %v978_v18 }
 0x1d4   : > { %v1815_v20 = vpop.eup %1528  ;;  %v1025_v21 = vmul.f32 1.442695, %v1003_v19  ;;  %v1112_v19 = vld [vmem:[%s1862_s21 + $0x18] sm:$0xff] }
 0x1d5   : > { %1055 = vadd.xlane.f32.xlu0 %v1815_v20 }
 0x1d6   : > { %1530 = vpow2.f32 %v1025_v21 }
 0x1d9   : > { %v980_v22 = vpop.xlane.xlu1 %979 }
 0x1da   : > { %v1004_v23 = vsub.f32 %v1771_v42, %v980_v22 }
 0x1dc   : > { %v1819_v24 = vpop.eup %1530  ;;  %v1027_v25 = vmul.f32 1.442695, %v1004_v23 }
 0x1dd   : > { %1057 = vadd.xlane.f32.xlu1 %v1819_v24 }
 0x1de   : > { %1532 = vpow2.f32 %v1027_v25 }
 0x1e1   : > { %v982_v26 = vpop.xlane.xlu2 %981 }
 0x1e2   : > { %v1005_v27 = vsub.f32 %v1774_v44, %v982_v26  ;;  %v1113_v26 = vld [vmem:[%s1862_s21 + $0x20] sm:$0xff] }
 0x1e4   : > { %v1823_v28 = vpop.eup %1532  ;;  %v1029_v29 = vmul.f32 1.442695, %v1005_v27 }
 0x1e5   : > { %1059 = vadd.xlane.f32.xlu2 %v1823_v28 }
 0x1e6   : > { %1534 = vpow2.f32 %v1029_v29 }
 0x1e9   : > { %v984_v30 = vpop.xlane.xlu0 %983 }
 0x1ea   : > { %v1006_v31 = vsub.f32 %v1777_v46, %v984_v30 }
 0x1ec   : > { %v1827_v32 = vpop.eup %1534  ;;  %v1031_v33 = vmul.f32 1.442695, %v1006_v31 }
 0x1ed   : > { %1061 = vadd.xlane.f32.xlu0 %v1827_v32 }
 0x1ee   : > { %1536 = vpow2.f32 %v1031_v33  ;;  %v1114_v33 = vld [vmem:[%s1862_s21 + $0x28] sm:$0xff] }
 0x1f1   : > { %v986_v39 = vpop.xlane.xlu1 %985 }
 0x1f2   : > { %v1007_v34 = vsub.f32 %v1780_v48, %v986_v39 }
 0x1f4   : > { %v1831_v35 = vpop.eup %1536  ;;  %v1033_v36 = vmul.f32 1.442695, %v1007_v34 }
 0x1f5   : > { %1063 = vadd.xlane.f32.xlu1 %v1831_v35 }
 0x1f6   : > { %1538 = vpow2.f32 %v1033_v36 }
 0x1f9   : > { %v988_v37 = vpop.xlane.xlu2 %987 }
 0x1fa   : > { %v1008_v38 = vsub.f32 %v1783_v50, %v988_v37 }
 0x1fc   : > { %v1835_v40 = vpop.eup %1538  ;;  %v1035_v41 = vmul.f32 1.442695, %v1008_v38  ;;  %v1115_v38 = vld [vmem:[%s1862_s21 + $0x30] sm:$0xff] }
 0x1fd   : > { %1065 = vadd.xlane.f32.xlu2 %v1835_v40 }
 0x1fe   : > { %1540 = vpow2.f32 %v1035_v41 }
 0x201   : > { %v990_v42 = vpop.xlane.xlu0 %989 }
 0x202   : > { %v1009_v43 = vsub.f32 %v1786_v52, %v990_v42 }
 0x204   : > { %v1839_v44 = vpop.eup %1540  ;;  %v1037_v45 = vmul.f32 1.442695, %v1009_v43 }
 0x205   : > { %1067 = vadd.xlane.f32.xlu0 %v1839_v44 }
 0x206   : > { %1542 = vpow2.f32 %v1037_v45 }
 0x209   : > { %v992_v46 = vpop.xlane.xlu1 %991 }
 0x20a   : > { %v1010_v47 = vsub.f32 %v1789_v54, %v992_v46  ;;  %v1116_v46 = vld [vmem:[%s1862_s21 + $0x38] sm:$0xff] }
 0x20c   : > { %v1843_v48 = vpop.eup %1542  ;;  %v1039_v49 = vmul.f32 1.442695, %v1010_v47 }
 0x20d   : > { %1069 = vadd.xlane.f32.xlu1 %v1843_v48 }
 0x20e   : > { %1544 = vpow2.f32 %v1039_v49 }
 0x211   : > { %v994_v50 = vpop.xlane.xlu2 %993 }
 0x212   : > { %v1011_v51 = vsub.f32 %v1792_v56, %v994_v50 }
 0x214   : > { %v1847_v52 = vpop.eup %1544  ;;  %v1041_v53 = vmul.f32 1.442695, %v1011_v51 }
 0x215   : > { %1071 = vadd.xlane.f32.xlu2 %v1847_v52 }
 0x216   : > { %1546 = vpow2.f32 %v1041_v53  ;;  %v1117_v53 = vld [vmem:[%s1862_s21 + $0x40] sm:$0xff] }
 0x219   : > { %v996_v55 = vpop.xlane.xlu0 %995 }
 0x21a   : > { %v1012_v54 = vsub.f32 %v1795_v61, %v996_v55  ;;  %v1109_v61 = vld [vmem:[%s1862_s21] sm:$0xff] }
 0x21c   : > { %v1851_v57 = vpop.eup %1546  ;;  %v1043_v58 = vmul.f32 1.442695, %v1012_v54 }
 0x21d   : > { %1073 = vadd.xlane.f32.xlu0 %v1851_v57 }
 0x21e   : > { %1548 = vpow2.f32 %v1043_v58 }
 0x220   : > { %v1046_v59 = vpop.xlane.xlu1 %1045 }
 0x221   : > { %1550 = vrcp.f32 %v1046_v59 }
 0x224   : > { %v1855_v60 = vpop.eup %1548 }
 0x225   : > { %1075 = vadd.xlane.f32.xlu1 %v1855_v60 }
 0x227   : > { %v1551_v56 = vpop.eup %1550 }
 0x228   : > { %v1048_v62 = vpop.xlane.xlu2 %1047  ;;  %v1093_v63 = vmul.f32 %v1551_v56, %v1798_v0  ;;  %v1118_v56 = vld [vmem:[%s1862_s21 + $0x48] sm:$0xff] }
 0x229   : > { %1552 = vrcp.f32 %v1048_v62 }
 0x22a   : > { %v1125_v1 = vmul.f32 %v1109_v61, %v1093_v63 }
 0x22c   : > { %v1142_v2 = vsel %vm1141_vm1, %v1125_v1, 0.0 }
 0x22d   : > { %1143 = vadd.xlane.f32.xlu2 %v1142_v2  ;;  %v1119_v2 = vld [vmem:[%s1862_s21 + $0x50] sm:$0xff] }
 0x22f   : > { %v1553_v3 = vpop.eup %1552 }
 0x230   : > { %v1050_v6 = vpop.xlane.xlu0 %1049  ;;  %v1094_v7 = vmul.f32 %v1553_v3, %v1801_v4 }
 0x231   : > { %1554 = vrcp.f32 %v1050_v6 }
 0x232   : > { %v1126_v9 = vmul.f32 %v1110_v5, %v1094_v7 }
 0x234   : > { %v1145_v10 = vsel %vm1141_vm1, %v1126_v9, 0.0  ;;  %v1120_v9 = vld [vmem:[%s1862_s21 + $0x58] sm:$0xff] }
 0x235   : > { %1146 = vadd.xlane.f32.xlu0 %v1145_v10 }
 0x237   : > { %v1555_v11 = vpop.eup %1554 }
 0x238   : > { %v1052_v0 = vpop.xlane.xlu1 %1051  ;;  %v1095_v14 = vmul.f32 %v1555_v11, %v1804_v8 }
 0x239   : > { %1556 = vrcp.f32 %v1052_v0 }
 0x23a   : > { %v1127_v15 = vmul.f32 %v1111_v13, %v1095_v14  ;;  %v1121_v14 = vld [vmem:[%s1862_s21 + $0x60] sm:$0xff] }
 0x23c   : > { %v1148_v17 = vsel %vm1141_vm1, %v1127_v15, 0.0 }
 0x23d   : > { %1149 = vadd.xlane.f32.xlu1 %v1148_v17 }
 0x23f   : > { %v1557_v18 = vpop.eup %1556 }
 0x240   : > { %v1054_v4 = vpop.xlane.xlu2 %1053  ;;  %v1096_v21 = vmul.f32 %v1557_v18, %v1807_v12 }
 0x241   : > { %1558 = vrcp.f32 %v1054_v4  ;;  %v1122_v4 = vld [vmem:[%s1862_s21 + $0x68] sm:$0xff] }
 0x242   : > { %v1128_v22 = vmul.f32 %v1112_v19, %v1096_v21 }
 0x244   : > { %v1151_v23 = vsel %vm1141_vm1, %v1128_v22, 0.0 }
 0x245   : > { %1152 = vadd.xlane.f32.xlu2 %v1151_v23 }
 0x247   : > { %v1559_v25 = vpop.eup %1558 }
 0x248   : > { %v1056_v8 = vpop.xlane.xlu0 %1055  ;;  %v1097_v27 = vmul.f32 %v1559_v25, %v1811_v16 }
 0x249   : > { %1560 = vrcp.f32 %v1056_v8 }
 0x24a   : > { %v1129_v29 = vmul.f32 %v1113_v26, %v1097_v27  ;;  %v1123_v26 = vld [vmem:[%s1862_s21 + $0x70] sm:$0xff] }
 0x24c   : > { %v1154_v30 = vsel %vm1141_vm1, %v1129_v29, 0.0 }
 0x24d   : > { %1155 = vadd.xlane.f32.xlu0 %v1154_v30  ;;  %v1124_v30 = vld [vmem:[%s1862_s21 + $0x78] sm:$0xff] }
 0x24f   : > { %v1561_v31 = vpop.eup %1560 }
 0x250   : > { %v1058_v12 = vpop.xlane.xlu1 %1057  ;;  %v1098_v39 = vmul.f32 %v1561_v31, %v1815_v20 }
 0x251   : > { %1562 = vrcp.f32 %v1058_v12 }
 0x252   : > { %v1130_v34 = vmul.f32 %v1114_v33, %v1098_v39 }
 0x254   : > { %v1157_v36 = vsel %vm1141_vm1, %v1130_v34, 0.0 }
 0x255   : > { %1158 = vadd.xlane.f32.xlu1 %v1157_v36 }
 0x257   : > { %v1563_v37 = vpop.eup %1562 }
 0x258   : > { %v1060_v16 = vpop.xlane.xlu2 %1059  ;;  %v1099_v41 = vmul.f32 %v1563_v37, %v1819_v24 }
 0x259   : > { %1564 = vrcp.f32 %v1060_v16 }
 0x25a   : > { %v1131_v42 = vmul.f32 %v1115_v38, %v1099_v41 }
 0x25c   : > { %v1160_v43 = vsel %vm1141_vm1, %v1131_v42, 0.0 }
 0x25d   : > { %1161 = vadd.xlane.f32.xlu2 %v1160_v43 }
 0x25f   : > { %v1565_v45 = vpop.eup %1564 }
 0x260   : > { %v1062_v20 = vpop.xlane.xlu0 %1061  ;;  %v1100_v47 = vmul.f32 %v1565_v45, %v1823_v28 }
 0x261   : > { %1566 = vrcp.f32 %v1062_v20 }
 0x262   : > { %v1132_v49 = vmul.f32 %v1116_v46, %v1100_v47 }
 0x264   : > { %v1163_v50 = vsel %vm1141_vm1, %v1132_v49, 0.0 }
 0x265   : > { %1164 = vadd.xlane.f32.xlu0 %v1163_v50 }
 0x267   : > { %v1567_v51 = vpop.eup %1566 }
 0x268   : > { %v1064_v24 = vpop.xlane.xlu1 %1063  ;;  %v1101_v55 = vmul.f32 %v1567_v51, %v1827_v32 }
 0x269   : > { %1568 = vrcp.f32 %v1064_v24 }
 0x26a   : > { %v1133_v54 = vmul.f32 %v1117_v53, %v1101_v55 }
 0x26c   : > { %v1166_v58 = vsel %vm1141_vm1, %v1133_v54, 0.0 }
 0x26d   : > { %1167 = vadd.xlane.f32.xlu1 %v1166_v58 }
 0x26f   : > { %v1569_v59 = vpop.eup %1568 }
 0x270   : > { %v1066_v28 = vpop.xlane.xlu2 %1065  ;;  %v1102_v61 = vmul.f32 %v1569_v59, %v1831_v35 }
 0x271   : > { %1570 = vrcp.f32 %v1066_v28 }
 0x272   : > { %v1134_v62 = vmul.f32 %v1118_v56, %v1102_v61 }
 0x274   : > { %v1169_v63 = vsel %vm1141_vm1, %v1134_v62, 0.0 }
 0x275   : > { %1170 = vadd.xlane.f32.xlu2 %v1169_v63 }
 0x277   : > { %v1571_v1 = vpop.eup %1570 }
 0x278   : > { %v1068_v32 = vpop.xlane.xlu0 %1067  ;;  %v1103_v3 = vmul.f32 %v1571_v1, %v1835_v40 }
 0x279   : > { %1572 = vrcp.f32 %v1068_v32 }
 0x27a   : > { %v1135_v5 = vmul.f32 %v1119_v2, %v1103_v3 }
 0x27c   : > { %v1172_v6 = vsel %vm1141_vm1, %v1135_v5, 0.0 }
 0x27d   : > { %1173 = vadd.xlane.f32.xlu0 %v1172_v6 }
 0x27f   : > { %v1573_v7 = vpop.eup %1572 }
 0x280   : > { %v1070_v35 = vpop.xlane.xlu1 %1069  ;;  %v1104_v10 = vmul.f32 %v1573_v7, %v1839_v44 }
 0x281   : > { %1574 = vrcp.f32 %v1070_v35 }
 0x282   : > { %v1136_v11 = vmul.f32 %v1120_v9, %v1104_v10 }
 0x284   : > { %v1175_v13 = vsel %vm1141_vm1, %v1136_v11, 0.0 }
 0x285   : > { %1176 = vadd.xlane.f32.xlu1 %v1175_v13 }
 0x287   : > { %v1575_v0 = vpop.eup %1574 }
 0x288   : > { %v1072_v40 = vpop.xlane.xlu2 %1071  ;;  %v1105_v15 = vmul.f32 %v1575_v0, %v1843_v48 }
 0x289   : > { %1576 = vrcp.f32 %v1072_v40 }
 0x28a   : > { %v1137_v17 = vmul.f32 %v1121_v14, %v1105_v15 }
 0x28c   : > { %v1178_v18 = vsel %vm1141_vm1, %v1137_v17, 0.0 }
 0x28d   : > { %1179 = vadd.xlane.f32.xlu2 %v1178_v18 }
 0x28f   : > { %v1577_v19 = vpop.eup %1576 }
 0x290   : > { %v1074_v44 = vpop.xlane.xlu0 %1073  ;;  %v1106_v21 = vmul.f32 %v1577_v19, %v1847_v52 }
 0x291   : > { %1578 = vrcp.f32 %v1074_v44 }
 0x292   : > { %v1138_v22 = vmul.f32 %v1122_v4, %v1106_v21 }
 0x294   : > { %v1181_v23 = vsel %vm1141_vm1, %v1138_v22, 0.0 }
 0x295   : > { %1182 = vadd.xlane.f32.xlu0 %v1181_v23 }
 0x297   : > { %v1579_v25 = vpop.eup %1578 }
 0x298   : > { %v1076_v48 = vpop.xlane.xlu1 %1075  ;;  %v1107_v8 = vmul.f32 %v1579_v25, %v1851_v57 }
 0x299   : > { %1580 = vrcp.f32 %v1076_v48 }
 0x29a   : > { %v1139_v27 = vmul.f32 %v1123_v26, %v1107_v8 }
 0x29c   : > { %v1184_v29 = vsel %vm1141_vm1, %v1139_v27, 0.0 }
 0x29d   : > { %1185 = vadd.xlane.f32.xlu1 %v1184_v29 }
 0x29f   : > { %v1581_v52 = vpop.eup %1580 }
 0x2a0   : > { %v1144_v57 = vpop.xlane.xlu2 %1143  ;;  %v1108_v31 = vmul.f32 %v1581_v52, %v1855_v60 }
 0x2a1   : > { %1191 = vst.msk [vmem:[%s1915_s24] sm:$0xff] %vm1190_vm2, %v1144_v57 }
 0x2a2   : > { %v1140_v33 = vmul.f32 %v1124_v30, %v1108_v31 }
 0x2a4   : > { %v1187_v12 = vsel %vm1141_vm1, %v1140_v33, 0.0 }
 0x2a5   : > { %1188 = vadd.xlane.f32.xlu2 %v1187_v12 }
 0x2a8   : > { %v1147_v39 = vpop.xlane.xlu0 %1146 }
 0x2a9   : > { %1192 = vst.msk [vmem:[%s1915_s24 + $0x8] sm:$0xff] %vm1190_vm2, %v1147_v39 }
 0x2b0   : > { %v1150_v34 = vpop.xlane.xlu1 %1149 }
 0x2b1   : > { %1193 = vst.msk [vmem:[%s1915_s24 + $0x10] sm:$0xff] %vm1190_vm2, %v1150_v34 }
 0x2b8   : > { %v1153_v36 = vpop.xlane.xlu2 %1152 }
 0x2b9   : > { %1194 = vst.msk [vmem:[%s1915_s24 + $0x18] sm:$0xff] %vm1190_vm2, %v1153_v36 }
 0x2c0   : > { %v1156_v60 = vpop.xlane.xlu0 %1155 }
 0x2c1   : > { %1195 = vst.msk [vmem:[%s1915_s24 + $0x20] sm:$0xff] %vm1190_vm2, %v1156_v60 }
 0x2c8   : > { %v1159_v37 = vpop.xlane.xlu1 %1158 }
 0x2c9   : > { %1196 = vst.msk [vmem:[%s1915_s24 + $0x28] sm:$0xff] %vm1190_vm2, %v1159_v37 }
 0x2d0   : > { %v1162_v38 = vpop.xlane.xlu2 %1161 }
 0x2d1   : > { %1197 = vst.msk [vmem:[%s1915_s24 + $0x30] sm:$0xff] %vm1190_vm2, %v1162_v38 }
 0x2d8   : > { %v1165_v16 = vpop.xlane.xlu0 %1164 }
 0x2d9   : > { %1198 = vst.msk [vmem:[%s1915_s24 + $0x38] sm:$0xff] %vm1190_vm2, %v1165_v16 }
 0x2e0   : > { %v1168_v41 = vpop.xlane.xlu1 %1167 }
 0x2e1   : > { %1199 = vst.msk [vmem:[%s1915_s24 + $0x40] sm:$0xff] %vm1190_vm2, %v1168_v41 }
 0x2e8   : > { %v1171_v42 = vpop.xlane.xlu2 %1170 }
 0x2e9   : > { %1200 = vst.msk [vmem:[%s1915_s24 + $0x48] sm:$0xff] %vm1190_vm2, %v1171_v42 }
 0x2f0   : > { %v1174_v43 = vpop.xlane.xlu0 %1173 }
 0x2f1   : > { %1201 = vst.msk [vmem:[%s1915_s24 + $0x50] sm:$0xff] %vm1190_vm2, %v1174_v43 }
 0x2f8   : > { %v1177_v45 = vpop.xlane.xlu1 %1176 }
 0x2f9   : > { %1202 = vst.msk [vmem:[%s1915_s24 + $0x58] sm:$0xff] %vm1190_vm2, %v1177_v45 }
 0x300   : > { %v1180_v46 = vpop.xlane.xlu2 %1179 }
 0x301   : > { %1203 = vst.msk [vmem:[%s1915_s24 + $0x60] sm:$0xff] %vm1190_vm2, %v1180_v46 }
 0x308   : > { %v1183_v20 = vpop.xlane.xlu0 %1182 }
 0x309   : > { %1204 = vst.msk [vmem:[%s1915_s24 + $0x68] sm:$0xff] %vm1190_vm2, %v1183_v20 }
 0x310   : > { %v1186_v47 = vpop.xlane.xlu1 %1185 }
 0x311   : > { %1205 = vst.msk [vmem:[%s1915_s24 + $0x70] sm:$0xff] %vm1190_vm2, %v1186_v47 }
 0x318   : > { %v1189_v49 = vpop.xlane.xlu2 %1188 }
 0x319   : > { %1206 = vst.msk [vmem:[%s1915_s24 + $0x78] sm:$0xff] %vm1190_vm2, %v1189_v49 }
 0x31a PF: > { %s18_s27 = sadd.s32 1, %s1588_s27  }
 0x31b   : > { %p15_p4 = scmp.ge.s32.totalorder %s18_s27, 4  }
 0x31d   :  { %17 = sbr.rel (!%p15_p4) target bundleno = 1 (0x1), region = 91 }

</bundles_post_ra>
